<compile_context>
chip_gen: v6e
topology: v6e:2x2x1
jax: 0.10.0
libtpu: 0.0.40
codegen_flags: <defaults>
</compile_context>

<pallas_src>
import jax
import jax.numpy as jnp
import numpy as np
from jax.experimental import pallas as pl
from jax.experimental.pallas import tpu as pltpu

KW = 3    # conv kernel width (kernel_size = (1, 3))
PAD = 1   # ZeroPad2d((1, 1, 0, 0)): one zero column each side


def conv_block_kernel(x_ref, w_ref, b_ref, scale_ref, shift_ref, o_ref):
    """One tile of rows.

    x_ref:     [TM, W*Cin]        bf16/f32, rows = (n, h), lanes = (w, c)
    w_ref:     [W*Cin, W*Cout]    banded conv matrix (same dtype as x)
    b_ref:     [1, W*Cout]  f32   conv bias tiled per output column
    scale_ref: [1, W*Cout]  f32   gamma / sqrt(running_var + eps), tiled
    shift_ref: [1, W*Cout]  f32   beta - running_mean * scale, tiled
    o_ref:     [TM, W*Cout] f32
    """
    acc = jnp.dot(x_ref[...], w_ref[...], preferred_element_type=jnp.float32)
    acc = jnp.maximum(acc + b_ref[...], 0.0)                     # bias + ReLU
    o_ref[...] = (acc * scale_ref[...] + shift_ref[...]).astype(o_ref.dtype)


def _banded_conv_matrix(w, w_in, dtype):
    """w: [Cout, Cin, 1, KW] -> BigW [W_in*Cin, W_out*Cout], zero-pad halo folded in."""
    cout, cin, _, kw = w.shape
    w_out = w_in + 2 * PAD - (kw - 1)
    wk = jnp.transpose(w[:, :, 0, :], (2, 1, 0))           # [KW, Cin, Cout]
    win = jnp.arange(w_in)[:, None]                         # input width index
    wout = jnp.arange(w_out)[None, :]                       # output width index
    k = win - wout + PAD                                     # tap index
    valid = (k >= 0) & (k < kw)
    band = jnp.where(valid[:, :, None, None],
                     wk[jnp.clip(k, 0, kw - 1)],            # [W_in, W_out, Cin, Cout]
                     0.0)
    big_w = jnp.transpose(band, (0, 2, 1, 3)).reshape(w_in * cin, w_out * cout)
    return big_w.astype(dtype), w_out


def _pick_tm(nh, in_row_bytes, out_row_bytes, tm_max=1024,
             vmem_budget_bytes=12 * 1024 * 1024):
    """Largest row tile whose double-buffered in+out blocks fit the VMEM budget."""
    per_row = in_row_bytes + out_row_bytes
    tm = min(tm_max, max(8, vmem_budget_bytes // (2 * per_row)))
    tm = max(8, (tm // 8) * 8)
    return nh if nh <= tm else tm


def conv_block_forward(x, w, b, gamma, beta, run_mean, run_var, eps=1e-5,
                       tm=None, compute_dtype=jnp.bfloat16, training=False):
    """x: [N, Cin, H, W] (NCHW, float32). Returns [N, Cout, H, W] float32."""
    N, Cin, H, W = x.shape
    Cout = w.shape[0]

    big_w, W_out = _banded_conv_matrix(w, W, compute_dtype)

    if training:
        # Kernel emits ReLU(conv + bias); batch-stat BN applied in the wrapper.
        scale = jnp.ones((Cout,), jnp.float32)
        shift = jnp.zeros((Cout,), jnp.float32)
    else:
        # Eval-mode BN folded into a per-channel affine fused after the ReLU.
        scale = gamma / jnp.sqrt(run_var + eps)
        shift = beta - run_mean * scale

    # Column index = wout*Cout + o, matching BigW's output layout.
    b_cols = jnp.tile(b, W_out).reshape(1, W_out * Cout).astype(jnp.float32)
    scale_cols = jnp.tile(scale, W_out).reshape(1, W_out * Cout).astype(jnp.float32)
    shift_cols = jnp.tile(shift, W_out).reshape(1, W_out * Cout).astype(jnp.float32)

    # NCHW -> rows=(n,h), lanes=(w,c).  (No jnp.pad: halo lives inside BigW.)
    NH = N * H
    x_rows = jnp.transpose(x, (0, 2, 3, 1)).reshape(NH, W * Cin).astype(compute_dtype)

    in_bytes = jnp.dtype(compute_dtype).itemsize
    if tm is None:
        tm = _pick_tm(NH, W * Cin * in_bytes, W_out * Cout * 4)
    else:
        tm = min(tm, NH)
        if tm < NH:
            tm = max(8, (tm // 8) * 8)

    grid = (pl.cdiv(NH, tm),)

    out_rows = pl.pallas_call(
        conv_block_kernel,
        out_shape=jax.ShapeDtypeStruct((NH, W_out * Cout), jnp.float32),
        grid_spec=pltpu.PrefetchScalarGridSpec(
            num_scalar_prefetch=0,
            grid=grid,
            in_specs=[
                pl.BlockSpec((tm, W * Cin), lambda i: (i, 0)),
                pl.BlockSpec((W * Cin, W_out * Cout), lambda i: (0, 0)),
                pl.BlockSpec((1, W_out * Cout), lambda i: (0, 0)),
                pl.BlockSpec((1, W_out * Cout), lambda i: (0, 0)),
                pl.BlockSpec((1, W_out * Cout), lambda i: (0, 0)),
            ],
            out_specs=pl.BlockSpec((tm, W_out * Cout), lambda i: (i, 0)),
        ),
        compiler_params=pltpu.CompilerParams(
            dimension_semantics=("parallel",),
            vmem_limit_bytes=32 * 1024 * 1024),
    )(x_rows, big_w, b_cols, scale_cols, shift_cols)

    y = out_rows.reshape(N, H, W_out, Cout)                       # NHWC
    if training:
        # Training-mode BatchNorm: biased batch stats over (N, H, W).
        mean = jnp.mean(y, axis=(0, 1, 2))
        var = jnp.var(y, axis=(0, 1, 2))
        y = (y - mean) * (gamma / jnp.sqrt(var + eps)) + beta
    return jnp.transpose(y, (0, 3, 1, 2))                         # NCHW


def reference_forward(x, w, b, gamma, beta, run_mean, run_var, eps=1e-5,
                      training=False):
    """Pure-JAX f32 reference with PyTorch semantics."""
    N, Cin, H, W = x.shape
    Cout = w.shape[0]
    x_pad = jnp.pad(x, ((0, 0), (0, 0), (0, 0), (PAD, PAD)))
    y = jnp.zeros((N, Cout, H, W), jnp.float32)
    for kw in range(KW):
        xs = x_pad[:, :, :, kw:kw + W]                            # [N, Cin, H, W]
        y = y + jnp.einsum('nchw,oc->nohw', xs, w[:, :, 0, kw])
    y = y + b[None, :, None, None]
    y = jnp.maximum(y, 0.0)
    if training:
        mean = jnp.mean(y, axis=(0, 2, 3))
        var = jnp.var(y, axis=(0, 2, 3))                          # biased, like PyTorch
    else:
        mean, var = run_mean, run_var
    scale = gamma / jnp.sqrt(var + eps)
    shift = beta - mean * scale
    return y * scale[None, :, None, None] + shift[None, :, None, None]


if __name__ == "__main__":
    key = jax.random.PRNGKey(0)
    N, Cin, Cout, H, W = 2, 4, 8, 16, 16

    k_x, k_w, k_b, k_g, k_be, k_m, k_v = jax.random.split(key, 7)
    x = jax.random.normal(k_x, (N, Cin, H, W), jnp.float32)
    # Conv2d(Cin, Cout, (1,3)) parameters
    fan_in = Cin * 1 * KW
    w = jax.random.normal(k_w, (Cout, Cin, 1, KW), jnp.float32) / np.sqrt(fan_in)
    b = 0.1 * jax.random.normal(k_b, (Cout,), jnp.float32)
    # BatchNorm2d(Cout) parameters / running stats
    gamma = 1.0 + 0.1 * jax.random.normal(k_g, (Cout,), jnp.float32)
    beta = 0.1 * jax.random.normal(k_be, (Cout,), jnp.float32)
    run_mean = 0.1 * jax.random.normal(k_m, (Cout,), jnp.float32)
    run_var = 1.0 + 0.1 * jax.random.uniform(k_v, (Cout,), jnp.float32)

    # Eval-mode BN, f32 streaming: tight check.
    ref_eval = reference_forward(x, w, b, gamma, beta, run_mean, run_var)
    out_f32 = jax.block_until_ready(
        conv_block_forward(x, w, b, gamma, beta, run_mean, run_var,
                           compute_dtype=jnp.float32))
    np.testing.assert_allclose(np.asarray(out_f32), np.asarray(ref_eval),
                               rtol=1e-5, atol=1e-5)

    # Training-mode BN (batch statistics), f32 streaming: tight check.
    ref_train = reference_forward(x, w, b, gamma, beta, run_mean, run_var,
                                  training=True)
    out_train = jax.block_until_ready(
        conv_block_forward(x, w, b, gamma, beta, run_mean, run_var,
                           compute_dtype=jnp.float32, training=True))
    np.testing.assert_allclose(np.asarray(out_train), np.asarray(ref_train),
                               rtol=1e-4, atol=1e-4)

    # Default bf16 streaming path (halves HBM traffic), f32 accumulation/epilogue.
    out_bf16 = jax.block_until_ready(
        conv_block_forward(x, w, b, gamma, beta, run_mean, run_var))
    np.testing.assert_allclose(np.asarray(out_bf16), np.asarray(ref_eval),
                               rtol=5e-2, atol=5e-2)

    assert out_bf16.shape == (N, Cout, H, W)
    print("KERNEL_OK")
</pallas_src>

<mosaic_0001>
module attributes {stable_mosaic.version = 11 : i64} {
  func.func @conv_block_kernel(%arg0: i32, %arg1: memref<32x64xf32, #tpu.memory_space<vmem>>, %arg2: memref<64x128xf32, #tpu.memory_space<vmem>>, %arg3: memref<1x128xf32, #tpu.memory_space<vmem>>, %arg4: memref<1x128xf32, #tpu.memory_space<vmem>>, %arg5: memref<1x128xf32, #tpu.memory_space<vmem>>, %arg6: memref<32x128xf32, #tpu.memory_space<vmem>>) attributes {dimension_semantics = [#tpu.dimension_semantics<parallel>], iteration_bounds = array<i64: 1>, scalar_prefetch = 0 : i64, scratch_operands = 0 : i64, tpu.core_type = #tpu.core_type<tc>, window_params = [{transform_indices = @transform_0, window_bounds = array<i64: 32, 64>}, {pipeline_mode = #tpu.pipeline_mode<synchronous>, transform_indices = @transform_1, window_bounds = array<i64: 64, 128>}, {pipeline_mode = #tpu.pipeline_mode<synchronous>, transform_indices = @transform_2, window_bounds = array<i64: 1, 128>}, {pipeline_mode = #tpu.pipeline_mode<synchronous>, transform_indices = @transform_3, window_bounds = array<i64: 1, 128>}, {pipeline_mode = #tpu.pipeline_mode<synchronous>, transform_indices = @transform_4, window_bounds = array<i64: 1, 128>}, {transform_indices = @transform_5, window_bounds = array<i64: 32, 128>}]} {
    %c0 = arith.constant 0 : index
    %c0_0 = arith.constant 0 : index
    %0 = vector.load %arg1[%c0, %c0_0] : memref<32x64xf32, #tpu.memory_space<vmem>>, vector<32x64xf32>
    %c0_1 = arith.constant 0 : index
    %c0_2 = arith.constant 0 : index
    %1 = vector.load %arg2[%c0_1, %c0_2] : memref<64x128xf32, #tpu.memory_space<vmem>>, vector<64x128xf32>
    %cst = arith.constant dense<0.000000e+00> : vector<32x128xf32>
    %2 = tpu.matmul %0, %1, %cst {dimension_numbers = #tpu.dot_dimension_numbers<[1], [0], [0], [1], [0, 0, 1, 1], [], []>} : vector<32x64xf32>, vector<64x128xf32>, vector<32x128xf32> -> vector<32x128xf32>
    %c0_3 = arith.constant 0 : index
    %c0_4 = arith.constant 0 : index
    %3 = vector.load %arg3[%c0_3, %c0_4] : memref<1x128xf32, #tpu.memory_space<vmem>>, vector<1x128xf32>
    %4 = vector.broadcast %3 : vector<1x128xf32> to vector<32x128xf32>
    %5 = arith.addf %2, %4 : vector<32x128xf32>
    %cst_5 = arith.constant 0.000000e+00 : f32
    %6 = vector.broadcast %cst_5 : f32 to vector<32x128xf32>
    %7 = arith.maximumf %5, %6 : vector<32x128xf32>
    %c0_6 = arith.constant 0 : index
    %c0_7 = arith.constant 0 : index
    %8 = vector.load %arg4[%c0_6, %c0_7] : memref<1x128xf32, #tpu.memory_space<vmem>>, vector<1x128xf32>
    %9 = vector.broadcast %8 : vector<1x128xf32> to vector<32x128xf32>
    %10 = arith.mulf %7, %9 : vector<32x128xf32>
    %c0_8 = arith.constant 0 : index
    %c0_9 = arith.constant 0 : index
    %11 = vector.load %arg5[%c0_8, %c0_9] : memref<1x128xf32, #tpu.memory_space<vmem>>, vector<1x128xf32>
    %12 = vector.broadcast %11 : vector<1x128xf32> to vector<32x128xf32>
    %13 = arith.addf %10, %12 : vector<32x128xf32>
    %c0_10 = arith.constant 0 : index
    %c0_11 = arith.constant 0 : index
    %14 = vector.load %arg6[%c0_10, %c0_11] : memref<32x128xf32, #tpu.memory_space<vmem>>, vector<32x128xf32>
    tpu.vector_store %arg6[%c0_10, %c0_11], %13 {strides = array<i32>} : memref<32x128xf32, #tpu.memory_space<vmem>>, vector<32x128xf32>,
    return
  }
  func.func @transform_0(%arg0: i32) -> (i32, i32) {
    %c0_i32 = arith.constant 0 : i32
    %c0_i32_0 = arith.constant 0 : i32
    return %arg0, %c0_i32 : i32, i32
  }
  func.func @transform_1(%arg0: i32) -> (i32, i32) {
    %c0_i32 = arith.constant 0 : i32
    %c0_i32_0 = arith.constant 0 : i32
    %c0_i32_1 = arith.constant 0 : i32
    return %c0_i32, %c0_i32_0 : i32, i32
  }
  func.func @transform_2(%arg0: i32) -> (i32, i32) {
    %c0_i32 = arith.constant 0 : i32
    %c0_i32_0 = arith.constant 0 : i32
    %c0_i32_1 = arith.constant 0 : i32
    return %c0_i32, %c0_i32_0 : i32, i32
  }
  func.func @transform_3(%arg0: i32) -> (i32, i32) {
    %c0_i32 = arith.constant 0 : i32
    %c0_i32_0 = arith.constant 0 : i32
    %c0_i32_1 = arith.constant 0 : i32
    return %c0_i32, %c0_i32_0 : i32, i32
  }
  func.func @transform_4(%arg0: i32) -> (i32, i32) {
    %c0_i32 = arith.constant 0 : i32
    %c0_i32_0 = arith.constant 0 : i32
    %c0_i32_1 = arith.constant 0 : i32
    return %c0_i32, %c0_i32_0 : i32, i32
  }
  func.func @transform_5(%arg0: i32) -> (i32, i32) {
    %c0_i32 = arith.constant 0 : i32
    %c0_i32_0 = arith.constant 0 : i32
    return %arg0, %c0_i32 : i32, i32
  }
}

</mosaic_0001>

<bundles_post_ra>
// kernel: tpu_custom_call.1
= control target key start
LH: loop header
LB: loop body
LE: loop exit
PB: predicated region body
PF: predicated region fallthrough
CT: control target
= control target key end

     0   :  { %10 = vsyncpa [#allocation3], 0  ;;  %s404_s0 = inlined_call_operand.hbm [shape: f32[32,64], index: 0, kind: input, shape index: {}]   ;;  %s405_s1 = inlined_call_operand.hbm [shape: f32[64,128], index: 1, kind: input, shape index: {}]   ;;  %s406_s2 = inlined_call_operand.vmem [shape: f32[1,128], index: 2, kind: input, shape index: {}]   ;;  %s407_s3 = inlined_call_operand.vmem [shape: f32[1,128], index: 3, kind: input, shape index: {}]   ;;  %s408_s4 = inlined_call_operand.vmem [shape: f32[1,128], index: 4, kind: input, shape index: {}]   ;;  %s409_s5 = inlined_call_operand.hbm [shape: f32[32,128], index: 5, kind: output, shape index: {}]  }
   0x1   :  { %11 = vsyncpa [#allocation6], 0 }
   0x2   :  { %12 = vsyncpa [#allocation4], 0  ;;  %s342_s18 = smov [#allocation2]  }
   0x3   :  { %s18_s19 = sshll.u32 %s342_s18, 4  ;;  %s19_s19 = int_to_ptr.vmem [resolvable:$true] %s18_s19 }
   0x4   :  { %s284_s20 = scalar_lea.vmem %s19_s19, 512  ;;  %p289_p1 = scmp.lt.s32.totalorder %s19_s19, %s19_s19 }
   0x5   :  { %p285_p0 = scmp.ne.s32.totalorder %s19_s19, %s284_s20  ;;  %p290_p2 = scmp.lt.s32.totalorder %s284_s20, %s284_s20 }
   0x7   :  { %p291_p3 = por %p290_p2, %p289_p1 }
   0x9   :  { %p292_p4 = pnand %p291_p3, %p285_p0 }
   0xb   :  { %295 = shalt.err (!%p292_p4)
}
   0xc   :  { %s343_s21 = smov 128   ;;  %s344_s22 = smov 8  }
   0xd   :  { %24 = dma.hbm_to_vmem [thread:$0]  %s404_s0, 512, %s19_s19, [#allocation3], %s343_s21, %s343_s21, %s344_s22  }
   0xe   :  { %s345_s25 = smov [#allocation5]  }
   0xf   :  { %s30_s26 = sshll.u32 %s345_s25, 4  ;;  %s31_s26 = int_to_ptr.vmem [resolvable:$true] %s30_s26 }
  0x10   :  { %s304_s27 = scalar_lea.vmem %s31_s26, 1024  ;;  %p309_p6 = scmp.lt.s32.totalorder %s31_s26, %s31_s26 }
  0x11   :  { %p305_p5 = scmp.ne.s32.totalorder %s31_s26, %s304_s27  ;;  %p310_p7 = scmp.lt.s32.totalorder %s304_s27, %s304_s27 }
  0x13   :  { %p311_p8 = por %p310_p7, %p309_p6 }
  0x15   :  { %p312_p9 = pnand %p311_p8, %p305_p5 }
  0x17   :  { %315 = shalt.err (!%p312_p9)
}
  0x18   :  { %36 = dma.hbm_to_vmem [thread:$0]  %s405_s1, 1024, %s31_s26, [#allocation6], %s343_s21, %s343_s21, %s344_s22  }
  0x19   :  { %336 = dma.done.wait [#allocation3], 512  }
  0x1a   :  { %337 = vsyncadd [#allocation3], 4294966784 }
  0x1b   :  { %338 = dma.done.wait [#allocation6], 1024  }
  0x1c   :  { %339 = vsyncadd [#allocation6], 4294966272  ;;  %v60_v0 = vld [vmem:[#allocation5 + $0x38] sm:$0xff]  ;;  %v59_v1 = vld [vmem:[#allocation5 + $0x30] sm:$0xff]  ;;  %vm68_vm0 = vcmask 523264  }
  0x1d   :  { %233 = vmatprep.subr.mxu0 %v60_v0  ;;  %255 = vmatprep.subr.mxu1 %v60_v0  ;;  %v58_v2 = vld [vmem:[#allocation5 + $0x28] sm:$0xff]  ;;  %v57_v3 = vld [vmem:[#allocation5 + $0x20] sm:$0xff]  ;;  %v56_v4 = vld [vmem:[#allocation5 + $0x18] sm:$0xff] }
  0x1e   :  { %234 = vmatpush3.msra.mxu0 %v60_v0  ;;  %263 = vmatpush3.msra.mxu1 %v60_v0  ;;  %v55_v5 = vld [vmem:[#allocation5 + $0x10] sm:$0xff]  ;;  %v54_v6 = vld [vmem:[#allocation5 + $0x8] sm:$0xff]  ;;  %v53_v7 = vld [vmem:[#allocation5] sm:$0xff] }
  0x1f   :  { %235 = vmatprep.subr.mxu0 %v59_v1  ;;  %256 = vmatprep.subr.mxu1 %v59_v1  ;;  %v49_v8 = vld [vmem:[#allocation2] sm:$0xff]  ;;  %v51_v9 = vld [vmem:[#allocation2 + $0x10] sm:$0xff]  ;;  %v50_v10 = vld [vmem:[#allocation2 + $0x8] sm:$0xff] }
  0x20   :  { %236 = vmatpush3.msra.mxu0 %v59_v1  ;;  %264 = vmatpush3.msra.mxu1 %v59_v1  ;;  %v52_v11 = vld [vmem:[#allocation2 + $0x18] sm:$0xff]  ;;  %v214_v12 = vld [vmem:[%s406_s2] ss:$0 sm:$0xff]  ;;  %s346_s2 = smov [#allocation7]  }
  0x21   :  { %237 = vmatprep.subr.mxu0 %v58_v2  ;;  %257 = vmatprep.subr.mxu1 %v58_v2  ;;  %v219_v17 = vld [vmem:[%s407_s3] ss:$0 sm:$0xff]  ;;  %s201_s9 = sshll.u32 %s346_s2, 4  ;;  %s202_s9 = int_to_ptr.vmem [resolvable:$true] %s201_s9 }
  0x22   :  { %238 = vmatpush3.msra.mxu0 %v58_v2  ;;  %265 = vmatpush3.msra.mxu1 %v58_v2  ;;  %v220_v24 = vld [vmem:[%s408_s4] ss:$0 sm:$0xff]  ;;  %s316_s3 = scalar_lea.vmem %s202_s9, 512  ;;  %p321_p11 = scmp.lt.s32.totalorder %s202_s9, %s202_s9 }
  0x23   :  { %239 = vmatprep.subr.mxu0 %v57_v3  ;;  %258 = vmatprep.subr.mxu1 %v57_v3  ;;  %p317_p10 = scmp.ne.s32.totalorder %s202_s9, %s316_s3  ;;  %p322_p12 = scmp.lt.s32.totalorder %s316_s3, %s316_s3 }
  0x24   :  { %240 = vmatpush3.msra.mxu0 %v57_v3  ;;  %266 = vmatpush3.msra.mxu1 %v57_v3 }
  0x25   :  { %241 = vmatprep.subr.mxu0 %v56_v4  ;;  %259 = vmatprep.subr.mxu1 %v56_v4  ;;  %p323_p13 = por %p322_p12, %p321_p11 }
  0x26   :  { %242 = vmatpush3.msra.mxu0 %v56_v4  ;;  %267 = vmatpush3.msra.mxu1 %v56_v4 }
  0x27   :  { %243 = vmatprep.subr.mxu0 %v55_v5  ;;  %260 = vmatprep.subr.mxu1 %v55_v5  ;;  %p324_p0 = pnand %p323_p13, %p317_p10 }
  0x28   :  { %244 = vmatpush3.msra.mxu0 %v55_v5  ;;  %268 = vmatpush3.msra.mxu1 %v55_v5 }
  0x29   :  { %245 = vmatprep.subr.mxu0 %v54_v6  ;;  %261 = vmatprep.subr.mxu1 %v54_v6 }
  0x2a   :  { %246 = vmatpush3.msra.mxu0 %v54_v6  ;;  %269 = vmatpush3.msra.mxu1 %v54_v6 }
  0x2b   :  { %247 = vmatprep.subr.mxu0 %v53_v7  ;;  %262 = vmatprep.subr.mxu1 %v53_v7 }
  0x2c   :  { %248 = vmatpush3.msra.mxu0 %v53_v7  ;;  %270 = vmatpush3.msra.mxu1 %v53_v7 }
  0x2d   :  { %249 = vmatprep.mubr.msk.f32.mxu0 %vm68_vm0, %v49_v8  ;;  %252 = vmatprep.mubr.msk.f32.mxu1 %vm68_vm0, %v51_v9 }
  0x2e   :  { %250 = vmatmul.mubr.msk.f32.vlgmr.msra.gmra.mxu0 %vm68_vm0, %v50_v10  ;;  %253 = vmatmul.mubr.msk.f32.vlgmr.msra.gmra.mxu1 %vm68_vm0, %v52_v11 }
  0xee   :  { %v251_v13 = vpop.f32.mrf.mxu0  ;;  %v254_v14 = vpop.f32.mrf.mxu1 }
  0xef   :  { %v153_v15 = vadd.f32 %v251_v13, %v214_v12  ;;  %v163_v16 = vadd.f32 %v254_v14, %v214_v12 }
  0xf0   :  { %v147_v18 = vpop.f32.mrf.mxu0  ;;  %v157_v19 = vpop.f32.mrf.mxu1 }
  0xf1   :  { %v167_v20 = vmax.f32 %v153_v15, 0.0  ;;  %v169_v21 = vmax.f32 %v163_v16, 0.0  ;;  %v148_v22 = vadd.f32 %v214_v12, %v147_v18  ;;  %v158_v23 = vadd.f32 %v214_v12, %v157_v19 }
  0xf3   :  { %v178_v25 = vmul.f32 %v219_v17, %v167_v20  ;;  %v180_v26 = vmul.f32 %v219_v17, %v169_v21  ;;  %v166_v27 = vmax.f32 %v148_v22, 0.0  ;;  %v168_v28 = vmax.f32 %v158_v23, 0.0 }
  0xf5   :  { %v189_v29 = vadd.f32 %v220_v24, %v178_v25  ;;  %v191_v30 = vadd.f32 %v220_v24, %v180_v26  ;;  %v177_v31 = vmul.f32 %v219_v17, %v166_v27  ;;  %v179_v32 = vmul.f32 %v219_v17, %v168_v28 }
  0xf7   :  { %193 = vst [vmem:[#allocation7 + $0x8] sm:$0xff] %v189_v29  ;;  %195 = vst [vmem:[#allocation7 + $0x18] sm:$0xff] %v191_v30  ;;  %v188_v33 = vadd.f32 %v220_v24, %v177_v31  ;;  %v190_v34 = vadd.f32 %v220_v24, %v179_v32 }
  0xf9   :  { %192 = vst [vmem:[#allocation7] sm:$0xff] %v188_v33  ;;  %194 = vst [vmem:[#allocation7 + $0x10] sm:$0xff] %v190_v34 }
  0xfa   :  { %327 = shalt.err (!%p324_p0)
}
  0xfb   :  { %207 = dma.vmem_to_hbm [thread:$0]  %s202_s9, 512, %s409_s5, [#allocation4], %s343_s21, %s343_s21, %s344_s22  }
  0xfc   :  { %340 = dma.done.wait [#allocation4], 512  }
  0xfd   :  { %341 = vsyncadd [#allocation4], 4294966784 }
  0xfe   :  { %211 = vsyncpa [#allocation3], 1 }
  0xff   :  { %212 = vsyncpa [#allocation6], 1 }
 0x100   :  { %213 = vsyncpa [#allocation4], 1 }

</bundles_post_ra>
